<compile_context>
chip_gen: v7x
topology: tpu7x:2x2x1
jax: 0.10.0
libtpu: 0.0.40
codegen_flags: <defaults>
</compile_context>

<pallas_src>
import math

import jax
import jax.numpy as jnp
from jax.experimental import pallas as pl
from jax.experimental.pallas import tpu as pltpu


# ----------------------------------------------------------------------------
# Tiling helpers / compiler params
# ----------------------------------------------------------------------------

_VMEM_LIMIT = 32 * 1024 * 1024  # explicit limit: raises v5e's 16 MiB default, safe on v7x (64 MiB)

_PARAMS_2D = pltpu.CompilerParams(
    dimension_semantics=("parallel", "parallel"),
    vmem_limit_bytes=_VMEM_LIMIT,
)


def _pick_tile(V, row_bytes, max_tile=512, vmem_budget=24 * 1024 * 1024):
    """Largest divisor of V that is a multiple of 8, <= max_tile, and whose
    double-buffered per-row working set fits the VMEM budget. Falls back to V
    itself (a block equal to the full dim is always layout-legal)."""
    cap = min(max_tile, max(8, vmem_budget // max(1, 2 * row_bytes)))
    best = None
    t = 8
    while t <= min(V, cap):
        if V % t == 0:
            best = t
        t += 8
    return best if best is not None else V


# ----------------------------------------------------------------------------
# Pallas kernels
# ----------------------------------------------------------------------------

def _pairwise_dist_kernel(a_ref, b_ref, b2_ref, o_ref):
    # a: (1, TV1, 3), b: (1, V2, 3), b2: (1, 1, V2) -> o: (1, TV1, V2)
    # NOTE: the per-row |a_i|^2 term is omitted; top_k / argmin over the last
    # axis are invariant to a per-row constant, so neighbor selection is identical.
    inner = jax.lax.dot_general(
        a_ref[0], b_ref[0], (((1,), (1,)), ((), ())),
        preferred_element_type=jnp.float32)          # (TV1, V2)
    o_ref[0] = -2.0 * inner + b2_ref[0]


def _make_linear_kernel(apply_relu):
    def kern(x_ref, w_ref, b_ref, o_ref):
        # x: (1, TV, Cin) f32, w: (Cin, Cout) bf16, b: (1, Cout) f32 -> o: (1, TV, Cout)
        y = jax.lax.dot_general(
            x_ref[0].astype(jnp.bfloat16), w_ref[...],
            (((1,), (0,)), ((), ())), preferred_element_type=jnp.float32)
        y = y + b_ref[...]
        if apply_relu:
            y = jnp.maximum(y, 0.0)
        o_ref[0] = y.astype(o_ref.dtype)
    return kern


def _make_agg_kernel(N, S, C, use_feat, use_center, out_relu):
    """Fused graph-conv aggregation, vertex-major.

    dirs (1, TV, N*3) @ block-diagonal support (N*3, N*S*C) -> relu -> optional
    elementwise * gathered neighbor features (1, TV, N*S*C) -> max over the N
    lane-blocks -> sum over the S lane-blocks -> (+ center) -> optional relu.
    All slices are at multiples of 128 lanes (S*C and C are multiples of 128).
    """
    SC = S * C

    def kern(*refs):
        refs = list(refs)
        dirs_ref = refs.pop(0)                         # (1, TV, N*3)
        sup_ref = refs.pop(0)                          # (N*3, N*S*C)
        feat_ref = refs.pop(0) if use_feat else None   # (1, TV, N*S*C)
        cen_ref = refs.pop(0) if use_center else None  # (1, TV, C)
        o_ref = refs[0]                                # (1, TV, C)

        theta = jax.lax.dot_general(
            dirs_ref[0], sup_ref[...], (((1,), (0,)), ((), ())),
            preferred_element_type=jnp.float32)        # (TV, N*S*C)
        theta = jnp.maximum(theta, 0.0)
        if use_feat:
            theta = theta * feat_ref[0]
        # max over neighbors (lane blocks of width S*C)
        m = theta[:, 0:SC]
        for j in range(1, N):
            m = jnp.maximum(m, theta[:, j * SC:(j + 1) * SC])
        # sum over supports (lane blocks of width C)
        out = m[:, 0:C]
        for s in range(1, S):
            out = out + m[:, s * C:(s + 1) * C]
        if use_center:
            out = out + cen_ref[0]
        if out_relu:
            out = jnp.maximum(out, 0.0)
        o_ref[0] = out.astype(o_ref.dtype)
    return kern


def _make_neighbor_max_kernel(N, C):
    def kern(f_ref, o_ref):
        # f: (1, TV, N*C) vertex-major -> o: (1, TV, C) max over the N lane-blocks
        f = f_ref[0]
        m = f[:, 0:C]
        for j in range(1, N):
            m = jnp.maximum(m, f[:, j * C:(j + 1) * C])
        o_ref[0] = m
    return kern


def _head_kernel(fm0_ref, fm1_ref, fm2_ref, fm3_ref, fm4_ref, gb_ref,
                 w0_ref, w1_ref, w2_ref, w3_ref, w4_ref,
                 wf2_ref, bf2_ref, wf3_ref, bf3_ref, o_ref):
    # Fused fc1 (split weight rows + per-batch global/bias term) -> relu ->
    # fc2 -> relu -> fc3 (lane-padded to 128). Weights are bf16, accumulate f32.
    def mm(x, w_ref):
        return jax.lax.dot_general(
            x.astype(jnp.bfloat16), w_ref[...],
            (((1,), (0,)), ((), ())), preferred_element_type=jnp.float32)

    x = (mm(fm0_ref[0], w0_ref) + mm(fm1_ref[0], w1_ref) + mm(fm2_ref[0], w2_ref)
         + mm(fm3_ref[0], w3_ref) + mm(fm4_ref[0], w4_ref))
    x = jnp.maximum(x + gb_ref[0], 0.0)                  # fc1 (bias + f_global folded in)
    x = jnp.maximum(mm(x, wf2_ref) + bf2_ref[...], 0.0)  # fc2
    y = mm(x, wf3_ref) + bf3_ref[...]                    # fc3 (padded, lane-dense store)
    o_ref[0] = y.astype(o_ref.dtype)


# ----------------------------------------------------------------------------
# Pallas wrappers
# ----------------------------------------------------------------------------

def pairwise_distance(a, b, max_tile=512):
    # a: (bs, V1, 3), b: (bs, V2, 3) -> (bs, V1, V2) (up to a per-row constant)
    bs, V1, _ = a.shape
    V2 = b.shape[1]
    a = a.astype(jnp.float32)
    b = b.astype(jnp.float32)
    b2 = jnp.sum(b * b, axis=-1)[:, None, :]                     # (bs, 1, V2)
    tv = _pick_tile(V1, row_bytes=4 * (3 + 2 * V2), max_tile=max_tile)
    # TODO(synk): for large V, keep a running per-row top-(k+1) over V2 tiles inside the
    # kernel instead of materializing the full V1xV2 matrix in HBM for jax.lax.top_k.
    return pl.pallas_call(
        _pairwise_dist_kernel,
        out_shape=jax.ShapeDtypeStruct((bs, V1, V2), jnp.float32),
        grid=(bs, V1 // tv),
        in_specs=[pl.BlockSpec((1, tv, 3), lambda i, j: (i, j, 0)),
                  pl.BlockSpec((1, V2, 3), lambda i, j: (i, 0, 0)),
                  pl.BlockSpec((1, 1, V2), lambda i, j: (i, 0, 0))],
        out_specs=pl.BlockSpec((1, tv, V2), lambda i, j: (i, j, 0)),
        compiler_params=_PARAMS_2D,
    )(a, b, b2)


def linear(x, w, b, relu=False, max_tile=512):
    # x: (bs, V, Cin) @ w (Cin, Cout) + b (Cout,)  -- w sent as bf16
    bs, V, Cin = x.shape
    Cout = w.shape[1]
    tv = _pick_tile(V, row_bytes=4 * (Cin + 2 * Cout), max_tile=max_tile)
    return pl.pallas_call(
        _make_linear_kernel(relu),
        out_shape=jax.ShapeDtypeStruct((bs, V, Cout), jnp.float32),
        grid=(bs, V // tv),
        in_specs=[pl.BlockSpec((1, tv, Cin), lambda i, j: (i, j, 0)),
                  pl.BlockSpec((Cin, Cout), lambda i, j: (0, 0)),
                  pl.BlockSpec((1, Cout), lambda i, j: (0, 0))],
        out_specs=pl.BlockSpec((1, tv, Cout), lambda i, j: (i, j, 0)),
        compiler_params=_PARAMS_2D,
    )(x.astype(jnp.float32), w.astype(jnp.bfloat16),
      b.reshape(1, Cout).astype(jnp.float32))


def graph_conv_agg(dirs, sup, S, C, feat=None, center=None, out_relu=False,
                   max_tile=512):
    # dirs: (bs, V, N, 3) vertex-major normalized neighbor directions
    # sup:  (3, S*C) normalized support directions
    # feat: optional (bs, V, N, S*C) gathered neighbor support features (vertex-major)
    # center: optional (bs, V, C) center feature
    bs, V, N, _ = dirs.shape
    SC = S * C
    dirs_flat = dirs.reshape(bs, V, N * 3)               # free reshape, no transpose
    # Block-diagonal support: one MXU pass produces theta for all N neighbors.
    sup_bd = jnp.kron(jnp.eye(N, dtype=jnp.float32), sup.astype(jnp.float32))  # (N*3, N*SC)

    row_bytes = 4 * (N * 3 + N * SC                      # dirs + theta working set
                     + (N * SC if feat is not None else 0)
                     + (C if center is not None else 0) + C)
    tv = _pick_tile(V, row_bytes, max_tile)

    args = [dirs_flat, sup_bd]
    in_specs = [pl.BlockSpec((1, tv, N * 3), lambda i, j: (i, j, 0)),
                pl.BlockSpec((N * 3, N * SC), lambda i, j: (0, 0))]
    if feat is not None:
        args.append(feat.reshape(bs, V, N * SC))         # free reshape, no transpose
        in_specs.append(pl.BlockSpec((1, tv, N * SC), lambda i, j: (i, j, 0)))
    if center is not None:
        args.append(center)
        in_specs.append(pl.BlockSpec((1, tv, C), lambda i, j: (i, j, 0)))
    return pl.pallas_call(
        _make_agg_kernel(N, S, C, feat is not None, center is not None, out_relu),
        out_shape=jax.ShapeDtypeStruct((bs, V, C), jnp.float32),
        grid=(bs, V // tv),
        in_specs=in_specs,
        out_specs=pl.BlockSpec((1, tv, C), lambda i, j: (i, j, 0)),
        compiler_params=_PARAMS_2D,
    )(*args)


def neighbor_max(feat, max_tile=512):
    # feat: (bs, V, N, C) vertex-major -> max over N -> (bs, V, C)
    bs, V, N, C = feat.shape
    tv = _pick_tile(V, row_bytes=4 * (N * C + C), max_tile=max_tile)
    return pl.pallas_call(
        _make_neighbor_max_kernel(N, C),
        out_shape=jax.ShapeDtypeStruct((bs, V, C), jnp.float32),
        grid=(bs, V // tv),
        in_specs=[pl.BlockSpec((1, tv, N * C), lambda i, j: (i, j, 0))],
        out_specs=pl.BlockSpec((1, tv, C), lambda i, j: (i, j, 0)),
        compiler_params=_PARAMS_2D,
    )(feat.reshape(bs, V, N * C).astype(jnp.float32))


def fused_head(fm0, fm1, fm2u, fm3u, fm4u, f_global, p_fc1, p_fc2, p_fc3,
               class_num, max_tile=512):
    # Fused conv1d head: fc1 (split weights, no fm_fuse concat) -> relu -> fc2 -> relu -> fc3.
    bs, V, _ = fm0.shape
    c0, c1, c2, c3, c4, cg = 128, 128, 256, 256, 512, 512
    W1, b1 = p_fc1["w"], p_fc1["b"]            # (1792, 512), (512,)
    assert W1.shape[0] == c0 + c1 + c2 + c3 + c4 + cg
    o1 = c0; o2 = o1 + c1; o3 = o2 + c2; o4 = o3 + c3; o5 = o4 + c4
    w0s, w1s, w2s, w3s, w4s, wgs = (W1[:o1], W1[o1:o2], W1[o2:o3],
                                    W1[o3:o4], W1[o4:o5], W1[o5:])
    # Per-batch term: contribution of the vertex-constant global feature + fc1 bias.
    gb = (f_global.astype(jnp.float32) @ wgs + b1)[:, None, :].astype(jnp.float32)  # (bs,1,512)

    W2, b2 = p_fc2["w"], p_fc2["b"]            # (512, 512), (512,)
    W3, b3 = p_fc3["w"], p_fc3["b"]            # (512, class_num), (class_num,)
    pad_c = max(128, ((class_num + 127) // 128) * 128)   # lane-dense final store
    W3p = jnp.zeros((W3.shape[0], pad_c), jnp.float32).at[:, :class_num].set(W3)
    b3p = jnp.zeros((pad_c,), jnp.float32).at[:class_num].set(b3)

    row_bytes = 4 * (c0 + c1 + c2 + c3 + c4 + 2 * 512 + pad_c)
    tv = _pick_tile(V, row_bytes, max_tile)
    bf16 = jnp.bfloat16

    out = pl.pallas_call(
        _head_kernel,
        out_shape=jax.ShapeDtypeStruct((bs, V, pad_c), jnp.float32),
        grid=(bs, V // tv),
        in_specs=[
            pl.BlockSpec((1, tv, c0), lambda i, j: (i, j, 0)),
            pl.BlockSpec((1, tv, c1), lambda i, j: (i, j, 0)),
            pl.BlockSpec((1, tv, c2), lambda i, j: (i, j, 0)),
            pl.BlockSpec((1, tv, c3), lambda i, j: (i, j, 0)),
            pl.BlockSpec((1, tv, c4), lambda i, j: (i, j, 0)),
            pl.BlockSpec((1, 1, 512), lambda i, j: (i, 0, 0)),
            pl.BlockSpec((c0, 512), lambda i, j: (0, 0)),
            pl.BlockSpec((c1, 512), lambda i, j: (0, 0)),
            pl.BlockSpec((c2, 512), lambda i, j: (0, 0)),
            pl.BlockSpec((c3, 512), lambda i, j: (0, 0)),
            pl.BlockSpec((c4, 512), lambda i, j: (0, 0)),
            pl.BlockSpec((512, 512), lambda i, j: (0, 0)),
            pl.BlockSpec((1, 512), lambda i, j: (0, 0)),
            pl.BlockSpec((512, pad_c), lambda i, j: (0, 0)),
            pl.BlockSpec((1, pad_c), lambda i, j: (0, 0)),
        ],
        out_specs=pl.BlockSpec((1, tv, pad_c), lambda i, j: (i, j, 0)),
        compiler_params=_PARAMS_2D,
    )(fm0, fm1, fm2u, fm3u, fm4u, gb,
      w0s.astype(bf16), w1s.astype(bf16), w2s.astype(bf16), w3s.astype(bf16),
      w4s.astype(bf16),
      W2.astype(bf16), b2.reshape(1, 512).astype(jnp.float32),
      W3p.astype(bf16), b3p.reshape(1, pad_c))
    return out[:, :, :class_num]


# ----------------------------------------------------------------------------
# JAX glue (gathers, top-k, normalize) — matches gcn3d helper semantics
# ----------------------------------------------------------------------------

def normalize(x, axis, eps=1e-12):
    n = jnp.sqrt(jnp.sum(x * x, axis=axis, keepdims=True))
    return x / jnp.maximum(n, eps)


def indexing_neighbor(tensor, index):
    # tensor: (bs, v, d), index: (bs, ...) -> (bs, ..., d)
    return jax.vmap(lambda t, i: t[i])(tensor, index)


def get_neighbor_index(vertices, neighbor_num, max_tile=512):
    # (bs, V, 3) -> (bs, V, neighbor_num)  (self excluded)
    bs, V, _ = vertices.shape
    d = pairwise_distance(vertices, vertices, max_tile=max_tile)
    d = jnp.where(jnp.eye(V, dtype=bool)[None], -jnp.inf, d)  # guarantee self is first
    _, idx = jax.lax.top_k(-d, neighbor_num + 1)
    return idx[:, :, 1:]


def get_nearest_index(target, source, max_tile=512):
    # (bs, v1, 3), (bs, v2, 3) -> (bs, v1)
    d = pairwise_distance(target, source, max_tile=max_tile)
    return jnp.argmin(d, axis=-1)


def conv_surface(nidx, vertices, directions, support_num, kernel_num, out_relu,
                 max_tile=512):
    neighbors = indexing_neighbor(vertices, nidx)                       # (bs, V, N, 3)
    ndn = normalize(neighbors - vertices[:, :, None, :], axis=-1)
    sdn = normalize(directions, axis=0)                                 # (3, S*K)
    return graph_conv_agg(ndn, sdn, support_num, kernel_num, out_relu=out_relu,
                          max_tile=max_tile)


def conv_layer(nidx, vertices, feature_map, p, support_num, out_channel, out_relu,
               max_tile=512):
    neighbors = indexing_neighbor(vertices, nidx)                       # (bs, V, N, 3)
    ndn = normalize(neighbors - vertices[:, :, None, :], axis=-1)
    sdn = normalize(p["directions"], axis=0)                            # (3, S*C)
    feature_out = linear(feature_map, p["weights"], p["bias"], relu=False,
                         max_tile=max_tile)
    feature_center = feature_out[:, :, :out_channel]                    # (bs, V, C)
    feature_support = feature_out[:, :, out_channel:]                   # (bs, V, S*C)
    # TODO(synk): fuse this gather into the agg kernel (scalar-prefetched nidx + manual
    # make_async_copy from HBM feature_support) so the (bs, V, N, S*C) tensor never hits HBM.
    feat_nb = indexing_neighbor(feature_support, nidx)                  # (bs, V, N, S*C)
    return graph_conv_agg(ndn, sdn, support_num, out_channel,
                          feat=feat_nb, center=feature_center, out_relu=out_relu,
                          max_tile=max_tile)


def pool_layer(vertices, feature_map, pooling_rate, neighbor_num, key, max_tile=512):
    bs, V, _ = vertices.shape
    nidx = get_neighbor_index(vertices, neighbor_num, max_tile=max_tile)
    nfeat = indexing_neighbor(feature_map, nidx)                        # (bs, V, N, C)
    pooled = neighbor_max(nfeat, max_tile=max_tile)                     # (bs, V, C)
    pool_num = V // pooling_rate
    # TODO(synk): torch.randperm is re-randomized every forward; here we use a fixed-seed
    # deterministic permutation instead.
    sample_idx = jax.random.permutation(key, V)[:pool_num]
    return vertices[:, sample_idx, :], pooled[:, sample_idx, :]


# ----------------------------------------------------------------------------
# Parameter init (deterministic, mirrors the module __init__ shapes)
# ----------------------------------------------------------------------------

def init_params(class_num, support_num, key):
    ks = jax.random.split(key, 16)

    def conv_surface_p(k, kernel_num):
        stdv = 1.0 / math.sqrt(support_num * kernel_num)
        return {"directions": jax.random.uniform(
            k, (3, support_num * kernel_num), jnp.float32, -stdv, stdv)}

    def conv_layer_p(k, in_c, out_c):
        stdv = 1.0 / math.sqrt(out_c * (support_num + 1))
        k1, k2, k3 = jax.random.split(k, 3)
        return {
            "weights": jax.random.uniform(k1, (in_c, (support_num + 1) * out_c),
                                          jnp.float32, -stdv, stdv),
            "bias": jax.random.uniform(k2, ((support_num + 1) * out_c,),
                                       jnp.float32, -stdv, stdv),
            "directions": jax.random.uniform(k3, (3, support_num * out_c),
                                             jnp.float32, -stdv, stdv),
        }

    def conv1d_p(k, in_c, out_c):
        bound = 1.0 / math.sqrt(in_c)
        k1, k2 = jax.random.split(k)
        return {"w": jax.random.uniform(k1, (in_c, out_c), jnp.float32, -bound, bound),
                "b": jax.random.uniform(k2, (out_c,), jnp.float32, -bound, bound)}

    dim_fuse = 128 + 128 + 256 + 256 + 512 + 512
    return {
        "conv_0": conv_surface_p(ks[0], 128),
        "conv_1": conv_layer_p(ks[1], 128, 128),
        "conv_2": conv_layer_p(ks[2], 128, 256),
        "conv_3": conv_layer_p(ks[3], 256, 256),
        "conv_4": conv_layer_p(ks[4], 256, 512),
        "fc1": conv1d_p(ks[5], dim_fuse, 512),
        "fc2": conv1d_p(ks[6], 512, 512),
        "fc3": conv1d_p(ks[7], 512, class_num),
    }


# ----------------------------------------------------------------------------
# GCN3D forward
# ----------------------------------------------------------------------------

def gcn3d_forward(vertices, params, neighbor_num, support_num, max_tile=512):
    bs, V, _ = vertices.shape

    nidx = get_neighbor_index(vertices, neighbor_num, max_tile=max_tile)
    fm_0 = conv_surface(nidx, vertices, params["conv_0"]["directions"],
                        support_num, 128, out_relu=True, max_tile=max_tile)
    fm_1 = conv_layer(nidx, vertices, fm_0, params["conv_1"],
                      support_num, 128, out_relu=True, max_tile=max_tile)
    v_pool_1, fm_pool_1 = pool_layer(vertices, fm_1, pooling_rate=4, neighbor_num=4,
                                     key=jax.random.PRNGKey(100), max_tile=max_tile)

    nidx = get_neighbor_index(v_pool_1, neighbor_num, max_tile=max_tile)
    fm_2 = conv_layer(nidx, v_pool_1, fm_pool_1, params["conv_2"],
                      support_num, 256, out_relu=True, max_tile=max_tile)
    fm_3 = conv_layer(nidx, v_pool_1, fm_2, params["conv_3"],
                      support_num, 256, out_relu=True, max_tile=max_tile)
    v_pool_2, fm_pool_2 = pool_layer(v_pool_1, fm_3, pooling_rate=4, neighbor_num=4,
                                     key=jax.random.PRNGKey(101), max_tile=max_tile)

    nidx = get_neighbor_index(v_pool_2, neighbor_num, max_tile=max_tile)
    fm_4 = conv_layer(nidx, v_pool_2, fm_pool_2, params["conv_4"],
                      support_num, 512, out_relu=False, max_tile=max_tile)

    f_global = jnp.max(fm_4, axis=1)                                    # (bs, 512)

    near_1 = get_nearest_index(vertices, v_pool_1, max_tile=max_tile)   # (bs, V)
    near_2 = get_nearest_index(vertices, v_pool_2, max_tile=max_tile)   # (bs, V)
    fm_2_up = indexing_neighbor(fm_2, near_1)                           # (bs, V, 256)
    fm_3_up = indexing_neighbor(fm_3, near_1)                           # (bs, V, 256)
    fm_4_up = indexing_neighbor(fm_4, near_2)                           # (bs, V, 512)

    class_num = params["fc3"]["w"].shape[1]
    pred = fused_head(fm_0, fm_1, fm_2_up, fm_3_up, fm_4_up, f_global,
                      params["fc1"], params["fc2"], params["fc3"],
                      class_num, max_tile=max_tile)
    return pred                                                         # (bs, V, class_num)


# ----------------------------------------------------------------------------

if __name__ == "__main__":
    class_num = 8
    support_num = 1
    neighbor_num = 3
    bs, vertice_num = 2, 64

    key = jax.random.PRNGKey(0)
    k_vert, k_param = jax.random.split(key)
    vertices = jax.random.normal(k_vert, (bs, vertice_num, 3), dtype=jnp.float32)

    params = init_params(class_num, support_num, k_param)

    # max_tile=32 at this toy size exercises the multi-tile (batch, vertex-tile) grids;
    # at realistic point-cloud sizes the default (512, VMEM-budgeted) is used.
    pred = gcn3d_forward(vertices, params, neighbor_num=neighbor_num,
                         support_num=support_num, max_tile=32)
    pred = jax.block_until_ready(pred)

    assert pred.shape == (bs, vertice_num, class_num), pred.shape
    assert jnp.all(jnp.isfinite(pred))
    print("KERNEL_OK")
</pallas_src>

<mosaic_0001>
module attributes {stable_mosaic.version = 11 : i64} {
  func.func @_pairwise_dist_kernel(%arg0: i32, %arg1: i32, %arg2: memref<1x32x3xf32, #tpu.memory_space<vmem>>, %arg3: memref<1x64x3xf32, #tpu.memory_space<vmem>>, %arg4: memref<1x1x64xf32, #tpu.memory_space<vmem>>, %arg5: memref<1x32x64xf32, #tpu.memory_space<vmem>>) attributes {dimension_semantics = [#tpu.dimension_semantics<parallel>, #tpu.dimension_semantics<parallel>], iteration_bounds = array<i64: 2, 2>, scalar_prefetch = 0 : i64, scratch_operands = 0 : i64, tpu.core_type = #tpu.core_type<tc>, window_params = [{transform_indices = @transform_0, window_bounds = array<i64: 1, 32, 3>}, {transform_indices = @transform_1, window_bounds = array<i64: 1, 64, 3>}, {transform_indices = @transform_2, window_bounds = array<i64: 1, 1, 64>}, {transform_indices = @transform_3, window_bounds = array<i64: 1, 32, 64>}]} {
    %c0 = arith.constant 0 : index
    %c0_0 = arith.constant 0 : index
    %c0_1 = arith.constant 0 : index
    %0 = vector.load %arg2[%c0, %c0_0, %c0_1] : memref<1x32x3xf32, #tpu.memory_space<vmem>>, vector<1x32x3xf32>
    %1 = vector.shape_cast %0 : vector<1x32x3xf32> to vector<32x3xf32>
    %c0_2 = arith.constant 0 : index
    %c0_3 = arith.constant 0 : index
    %c0_4 = arith.constant 0 : index
    %2 = vector.load %arg3[%c0_2, %c0_3, %c0_4] : memref<1x64x3xf32, #tpu.memory_space<vmem>>, vector<1x64x3xf32>
    %3 = vector.shape_cast %2 : vector<1x64x3xf32> to vector<64x3xf32>
    %cst = arith.constant dense<0.000000e+00> : vector<32x64xf32>
    %4 = tpu.matmul %1, %3, %cst {dimension_numbers = #tpu.dot_dimension_numbers<[1], [1], [0], [0], [0, 0, 1, 0], [], []>} : vector<32x3xf32>, vector<64x3xf32>, vector<32x64xf32> -> vector<32x64xf32>
    %cst_5 = arith.constant -2.000000e+00 : f32
    %5 = vector.broadcast %cst_5 : f32 to vector<32x64xf32>
    %6 = arith.mulf %5, %4 : vector<32x64xf32>
    %c0_6 = arith.constant 0 : index
    %c0_7 = arith.constant 0 : index
    %c0_8 = arith.constant 0 : index
    %7 = vector.load %arg4[%c0_6, %c0_7, %c0_8] : memref<1x1x64xf32, #tpu.memory_space<vmem>>, vector<1x1x64xf32>
    %8 = vector.shape_cast %7 : vector<1x1x64xf32> to vector<1x64xf32>
    %9 = vector.broadcast %8 : vector<1x64xf32> to vector<32x64xf32>
    %10 = arith.addf %6, %9 : vector<32x64xf32>
    %c0_9 = arith.constant 0 : index
    %c0_10 = arith.constant 0 : index
    %c0_11 = arith.constant 0 : index
    %11 = vector.load %arg5[%c0_9, %c0_10, %c0_11] : memref<1x32x64xf32, #tpu.memory_space<vmem>>, vector<1x32x64xf32>
    %12 = vector.shape_cast %11 : vector<1x32x64xf32> to vector<32x64xf32>
    %13 = vector.shape_cast %10 : vector<32x64xf32> to vector<1x32x64xf32>
    tpu.vector_store %arg5[%c0_9, %c0_10, %c0_11], %13 {strides = array<i32>} : memref<1x32x64xf32, #tpu.memory_space<vmem>>, vector<1x32x64xf32>,
    return
  }
  func.func @transform_0(%arg0: i32, %arg1: i32) -> (i32, i32, i32) {
    %c0_i32 = arith.constant 0 : i32
    %c0_i32_0 = arith.constant 0 : i32
    return %arg0, %arg1, %c0_i32 : i32, i32, i32
  }
  func.func @transform_1(%arg0: i32, %arg1: i32) -> (i32, i32, i32) {
    %c0_i32 = arith.constant 0 : i32
    %c0_i32_0 = arith.constant 0 : i32
    %c0_i32_1 = arith.constant 0 : i32
    return %arg0, %c0_i32, %c0_i32_0 : i32, i32, i32
  }
  func.func @transform_2(%arg0: i32, %arg1: i32) -> (i32, i32, i32) {
    %c0_i32 = arith.constant 0 : i32
    %c0_i32_0 = arith.constant 0 : i32
    %c0_i32_1 = arith.constant 0 : i32
    return %arg0, %c0_i32, %c0_i32_0 : i32, i32, i32
  }
  func.func @transform_3(%arg0: i32, %arg1: i32) -> (i32, i32, i32) {
    %c0_i32 = arith.constant 0 : i32
    %c0_i32_0 = arith.constant 0 : i32
    return %arg0, %arg1, %c0_i32 : i32, i32, i32
  }
}

</mosaic_0001>

<bundles_post_ra>
// kernel: tpu_custom_call.1
= control target key start
LH: loop header
LB: loop body
LE: loop exit
PB: predicated region body
PF: predicated region fallthrough
CT: control target
= control target key end

     0   :  { %8 = vsyncpa [#allocation3], 0  ;;  %s992_s0 = inlined_call_operand.vmem [shape: f32[2,64,3], index: 0, kind: input, shape index: {}]   ;;  %s993_s1 = inlined_call_operand.vmem [shape: f32[2,64,3], index: 1, kind: input, shape index: {}]   ;;  %s994_s2 = inlined_call_operand.vmem [shape: f32[2,1,64], index: 2, kind: input, shape index: {}]   ;;  %s995_s3 = inlined_call_operand.hbm [shape: f32[2,64,64], index: 3, kind: output, shape index: {}]  }
   0x1   :  { %10 = vsyncpa [#allocation3 + $0x1], 0  ;;  %s796_s12 = smov 0   ;;  %s798_s13 = smov 0  }
   0x2   :  { %s800_s14 = smov 0   ;;  %s802_s15 = smov 0  }
   0x3   :  { %s804_s16 = smov 0   ;;  %s806_s17 = smov 0  }
   0x4   :  { %s808_s18 = smov 0   ;;  %s810_s19 = smov 0  }
   0x5 LB: > { %s507_s20 = sadd.s32 4294967295, %s771_s19   ;;  %s508_s21 = sadd.s32 4294967294, %s771_s19   ;;  %s771_s19 = sphi %s810_s19, %s16_s19   ;;  %s767_s18 = sphi %s808_s18, %s1006_s18   ;;  %s763_s17 = sphi %s806_s17, %s1005_s17   ;;  %s759_s16 = sphi %s804_s16, %s1004_s16   ;;  %s755_s15 = sphi %s802_s15, %s1003_s15   ;;  %s751_s14 = sphi %s800_s14, %s1002_s14   ;;  %s747_s13 = sphi %s798_s13, %s1001_s13   ;;  %s743_s12 = sphi %s796_s12, %s1000_s12  }
   0x6   : > { %s25_s22 = sadd.s32 1, %s763_s17  ;;  %s28_s23 = sadd.s32 1, %s767_s18 }
   0x7   : > { %p26_p0 = scmp.ge.s32.totalorder %s25_s22, 2  ;;  %p127_p1 = scmp.ne.s32.totalorder %s751_s14, %s747_s13 }
   0x8   : > { %p128_p2 = scmp.eq.s32.totalorder %s507_s20, 3  ;;  %p133_p5 = scmp.ne.s32.totalorder %s747_s13, %s743_s12 }
   0x9   : > { %s1008_s22 = smov (%p26_p0, %s25_s22), 0  ;;  %s1010_s23 = smov (!%p26_p0, %s28_s23), %s767_s18 }
   0xa   : > { %s113_s24 = ssub.s32 %s763_s17, %s1008_s22  ;;  %p847_p3 = por %p128_p2, %p127_p1 }
   0xb   : > { %p30_p4 = scmp.ge.s32.totalorder %s1010_s23, 2  ;;  %p134_p6 = scmp.eq.s32.totalorder %s508_s21, 3 }
   0xc   : > { %p511_p7 = scmp.ge.s32.totalorder %s771_s19, 1  ;;  %p179_p9 = scmp.lt.s32.totalorder %s771_s19, 5 }
   0xd   : > { %s1012_s23 = smov (%p30_p4, %s1010_s23), 0  ;;  %p856_p8 = por %p134_p6, %p133_p5 }
   0xe   : > { %s112_s27 = ssub.s32 %s767_s18, %s1012_s23  ;;  %s117_s28 = sadd.s32 1, %s751_s14 }
   0xf   : > { %s114_s29 = sor.u32 %s113_s24, %s112_s27  ;;  %p180_p10 = pnand %p511_p7, %p179_p9 }
  0x10   : > { %p115_p11 = scmp.eq.s32.totalorder %s114_s29, 0  ;;  %p216_p12 = scmp.lt.s32.totalorder (!%p180_p10), %s759_s16, 1  ;;  %vm246_vm0 = vcmask (!%p180_p10), 23552   ;;  %vm383_vm2 = vcmask (!%p180_p10), 523264  }
  0x11   : > { %183 = sbr.rel (%p180_p10) target bundleno = 295 (0x127), region = 32  ;;  %s869_s4 = sshll.u32 (!%p180_p10), %s755_s15, 2  ;;  %vm883_vm1 = vmpackc.low (!%p180_p10), %vm246_vm0, %vm246_vm0 }
  0x12   : > { %s865_s30 = scalar_select %p115_p11, %s751_s14, %s117_s28  }
  0x13   : > { %p218_p13 = scmp.lt.s32.totalorder (!%p180_p10), %s869_s4, 7  ;;  %s212_s28 = sand.u32 (!%p180_p10), 1, %s747_s13  }
  0x14   : > { %s533_s29 = sshll.u32 (!%p180_p10), %s759_s16, 3 }
  0x18   : > { %s873_s5 = scalar_select %p216_p12, %s759_s16, 1 }
  0x19   : > { %s219_s6 = scalar_select %p218_p13, %s869_s4, 7 }
  0x1a   : > { %s537_s7 = sshll.u32 %s873_s5, 6  ;;  %s514_s8 = sshll.u32 %s873_s5, 3 }
  0x1b   : > { %s229_s11 = scalar_lea.vmem %s993_s1, %s537_s7  ;;  %s221_s15 = sadd.s32 %s514_s8, %s219_s6 }
  0x1c   : > { %v238_v1 = vld [vmem:[%s229_s11] sm:$0xff]  ;;  %v239_v2 = vld [vmem:[%s229_s11 + $0x8] sm:$0xff]  ;;  %v240_v3 = vld [vmem:[%s229_s11 + $0x10] sm:$0xff]  ;;  %s515_s20 = sshll.u32 %s221_s15, 3  ;;  %s512_s6 = sshll.u32 %s212_s28, 5 }
  0x1d   : > { %v572_v4 = vpack.c.bf16 %v239_v2, %v238_v1  ;;  %v241_v5 = vld [vmem:[%s229_s11 + $0x18] sm:$0xff]  ;;  %s223_s27 = scalar_lea.vmem %s992_s0, %s515_s20  ;;  %v242_v9 = vld [vmem:[%s229_s11 + $0x20] sm:$0xff]  ;;  %v243_v10 = vld [vmem:[%s229_s11 + $0x28] sm:$0xff]  ;;  %s401_s7 = sadd.s32 %s533_s29, %s869_s4 }
  0x1e   : > { %v578_v6 = vpack.c.bf16 %v241_v5, %v240_v3  ;;  %v234_v7 = vld [vmem:[%s223_s27] sm:$0xff]  ;;  %v236_v8 = vld [vmem:[%s223_s27 + $0x10] sm:$0xff]  ;;  %v584_v11 = vpack.c.bf16 %v243_v10, %v242_v9  ;;  %v245_v13 = vld [vmem:[%s229_s11 + $0x38] sm:$0xff]  ;;  %s232_s10 = scalar_lea.vmem %s994_s2, %s873_s5  ;;  %s214_s15 = scalar_lea.vmem [#allocation2], %s512_s6 }
  0x1f   : > { %574 = vmatprep.subr.msk.bf16.mxu0 %vm883_vm1, %v572_v4  ;;  %596 = vmatprep.subr.msk.bf16.mxu1 %vm883_vm1, %v572_v4  ;;  %v244_v12 = vld [vmem:[%s229_s11 + $0x30] sm:$0xff]  ;;  %v235_v15 = vld [vmem:[%s223_s27 + $0x8] sm:$0xff]  ;;  %v237_v16 = vld [vmem:[%s223_s27 + $0x18] sm:$0xff]  ;;  %s534_s11 = sshll.u32 %s401_s7, 7  ;;  %s404_s20 = sshll.u32 %s214_s15, 4  ;;  %s938_s20 = int_to_ptr.vmem [resolvable:$true] %s404_s20 }
  0x20   : > { %577 = vmatpush3.bf16.xpose.msk.msra.mxu0 %vm883_vm1, %v572_v4  ;;  %600 = vmatpush3.bf16.xpose.msk.msra.mxu1 %vm883_vm1, %v572_v4  ;;  %v590_v14 = vpack.c.bf16 %v245_v13, %v244_v12  ;;  %v530_v18 = vld [vmem:[%s232_s10] ss:$0 sm:$0xff]  ;;  %s936_s16 = scalar_lea.hbm %s995_s3, %s534_s11  ;;  %s940_s4 = scalar_lea.sflag [#allocation3], %s212_s28 }
  0x21   : > { %580 = vmatprep.subr.msk.bf16.mxu0 %vm883_vm1, %v578_v6  ;;  %597 = vmatprep.subr.msk.bf16.mxu1 %vm883_vm1, %v578_v6  ;;  %s677_s5 = scalar_lea.vmem %s938_s20, 512  ;;  %s773_s27 = smov [#allocation2]  }
  0x22   : > { %566 = vmatprep.mubr.msk.f32.mxu0 %vm246_vm0, %v234_v7  ;;  %569 = vmatprep.mubr.msk.f32.mxu1 %vm246_vm0, %v236_v8  ;;  %p678_p0 = scmp.ne.s32.totalorder %s938_s20, %s677_s5  ;;  %s681_s29 = sshll.u32 %s773_s27, 4  ;;  %s682_s29 = int_to_ptr.vmem [resolvable:$false] %s681_s29 }
  0x23   : > { %s683_s6 = scalar_lea.vmem %s682_s29, 1024  ;;  %p684_p4 = scmp.lt.s32.totalorder %s938_s20, %s682_s29 }
  0x24   : > { %p679_p1 = pnand %p678_p0, %p847_p3  ;;  %p685_p5 = scmp.lt.s32.totalorder %s683_s6, %s677_s5 }
  0x26   : > { %p680_p2 = pneg %p679_p1  ;;  %p686_p6 = por %p685_p5, %p684_p4 }
  0x28   : > { %583 = vmatpush3.bf16.xpose.msk.msra.mxu0 %vm883_vm1, %v578_v6  ;;  %601 = vmatpush3.bf16.xpose.msk.msra.mxu1 %vm883_vm1, %v578_v6  ;;  %p687_p7 = pnand %p686_p6, %p680_p2 }
  0x29   : > { %586 = vmatprep.subr.msk.bf16.mxu0 %vm883_vm1, %v584_v11  ;;  %598 = vmatprep.subr.msk.bf16.mxu1 %vm883_vm1, %v584_v11 }
  0x30   : > { %589 = vmatpush3.bf16.xpose.msk.msra.mxu0 %vm883_vm1, %v584_v11  ;;  %602 = vmatpush3.bf16.xpose.msk.msra.mxu1 %vm883_vm1, %v584_v11 }
  0x31   : > { %592 = vmatprep.subr.msk.bf16.mxu0 %vm883_vm1, %v590_v14  ;;  %599 = vmatprep.subr.msk.bf16.mxu1 %vm883_vm1, %v590_v14 }
  0x38   : > { %595 = vmatpush3.bf16.xpose.msk.msra.mxu0 %vm883_vm1, %v590_v14  ;;  %603 = vmatpush3.bf16.xpose.msk.msra.mxu1 %vm883_vm1, %v590_v14 }
  0x3f   : > { %567 = vmatmul.mubr.msk.f32.vlgmr.msra.gmra.mrb[0].mxu0 %vm246_vm0, %v235_v15  ;;  %570 = vmatmul.mubr.msk.f32.vlgmr.msra.gmra.mrb[0].mxu1 %vm246_vm0, %v237_v16 }
 0x112   : > { %v568_v17 = vpop.f32.mrb[0].mxu0  ;;  %v571_v19 = vpop.f32.mrb[0].mxu1 }
 0x113   : > { %v369_v20 = vmul.f32 -2.0, %v568_v17  ;;  %v371_v21 = vmul.f32 -2.0, %v571_v19  ;;  %v349_v22 = vpop.f32.mrb[1].mxu0  ;;  %v359_v23 = vpop.f32.mrb[1].mxu1 }
 0x114   : > { %v368_v24 = vmul.f32 -2.0, %v349_v22  ;;  %v370_v25 = vmul.f32 -2.0, %v359_v23 }
 0x115   : > { %v380_v26 = vadd.f32 %v530_v18, %v369_v20  ;;  %v382_v27 = vadd.f32 %v530_v18, %v371_v21 }
 0x116   : > { %v379_v28 = vadd.f32 %v530_v18, %v368_v24  ;;  %v381_v29 = vadd.f32 %v530_v18, %v370_v25 }
 0x117   : > { %385 = vst.msk [vmem:[%s214_s15 + $0x8] sm:$0xff] %vm383_vm2, %v380_v26  ;;  %387 = vst.msk [vmem:[%s214_s15 + $0x18] sm:$0xff] %vm383_vm2, %v382_v27 }
 0x118   : > { %384 = vst.msk [vmem:[%s214_s15] sm:$0xff] %vm383_vm2, %v379_v28  ;;  %386 = vst.msk [vmem:[%s214_s15 + $0x10] sm:$0xff] %vm383_vm2, %v381_v29 }
 0x119   : > { %690 = shalt.err (!%p687_p7)
}
 0x11a   : > { %s691_s28 = scalar_lea.hbm %s936_s16, 512  ;;  %s695_s9 = scalar_lea.hbm %s995_s3, 2048 }
 0x11b   : > { %p692_p9 = scmp.ne.s32.totalorder %s936_s16, %s691_s28  ;;  %p696_p12 = scmp.lt.u32.totalorder %s936_s16, %s995_s3 }
 0x11c   : > { %p697_p13 = scmp.lt.u32.totalorder %s695_s9, %s691_s28  ;;  %p699_p1 = scmp.lt.u32.totalorder %s691_s28, %s936_s16 }
 0x11d   : > { %p693_p10 = pnand %p692_p9, %p847_p3 }
 0x11e   : > { %p698_p0 = por %p697_p13, %p696_p12 }
 0x11f   : > { %p694_p11 = pneg %p693_p10 }
 0x120   : > { %p700_p2 = por %p699_p1, %p698_p0 }
 0x122   : > { %p701_p4 = pnand %p700_p2, %p694_p11 }
 0x124   : > { %704 = shalt.err (!%p701_p4)
}
 0x125   : > { %s774_s15 = smov 128   ;;  %s775_s21 = smov 8  }
 0x126   : > { %604 = dma.vmem_to_hbm [thread:$0]  (%p847_p3), %s938_s20, 512, %s936_s16, %s940_s4, %s774_s15, %s774_s15, %s775_s21  }
 0x127 PF: > { %p610_p5 = scmp.ge.s32.totalorder %s771_s19, 2  ;;  %s419_s24 = sand.u32 1, %s743_s12  }
 0x128   : > { %s420_s5 = scalar_lea.sflag [#allocation3], %s419_s24 }
 0x129   : > { %p607_p6 = pnand %p610_p5, %p856_p8 }
 0x12b   : > { %738 = dma.done.wait (!%p607_p6), %s420_s5, 512  }
 0x12c   : > { %740 = vsyncadd (!%p607_p6), %s420_s5, 4294966784  ;;  %s16_s19 = sadd.s32 1, %s771_s19   ;;  %s1000_s12 = smov %s747_s13 }
 0x12d   : > { %p13_p7 = scmp.ge.s32.totalorder %s16_s19, 6   ;;  %s1001_s13 = smov %s751_s14 }
 0x12e   : > { %s1002_s14 = smov %s865_s30  ;;  %s1003_s15 = smov %s763_s17 }
 0x12f   : > { %s1004_s16 = smov %s767_s18  ;;  %s1005_s17 = smov %s1008_s22 }
 0x130   : > { %s1006_s18 = smov %s1012_s23  ;;  %15 = sbr.rel (!%p13_p7) target bundleno = 5 (0x5), region = 73 }
 0x137   :  { %425 = vsyncpa [#allocation3], 1 }
 0x138   :  { %427 = vsyncpa [#allocation3 + $0x1], 1 }

</bundles_post_ra>
